<compile_context>
chip_gen: v5e
topology: v5e:2x2
jax: 0.10.0
libtpu: 0.0.40
codegen_flags: <defaults>
</compile_context>

<pallas_src>
import jax
import jax.numpy as jnp
from jax.experimental import pallas as pl
from jax.experimental.pallas import tpu as pltpu

LANE = 128                    # TPU lane width; batch tiles live on the lane axis.
MAX_DEFAULT_TILE = 16 * 1024  # ~7 MiB/step at f32 streaming -> fits every scoped-VMEM default.


def _round_up(x, m):
    return (x + m - 1) // m * m


def _cdiv(a, b):
    return -(-a // b)


def actor_kernel(s_ref, w1_ref, b1_ref, w2_ref, b2_ref, w3_ref, b3_ref, out_ref):
    """One batch tile of the Actor MLP.

    s_ref  : (tile_batch, state_dim)      natural row-major block of `s`
    wX_ref : (out_features, in_features)  PyTorch-native layout (VMEM-resident)
    bX_ref : (out_features, 1)
    out_ref: (action_dim, tile_batch)     batch on lanes -> lane-dense stores
    """
    s = s_ref[...]

    # (mid, state) x (tile, state) contracted over state -> (mid, tile):
    # batch ends up on the lane axis without any wrapper-side HBM transpose.
    h1 = jax.lax.dot_general(
        w1_ref[...], s, (((1,), (1,)), ((), ())),
        preferred_element_type=jnp.float32)
    h1 = jnp.maximum(h1 + b1_ref[...].astype(jnp.float32), 0.0)   # bias + ReLU in f32
    h1 = h1.astype(w2_ref.dtype)   # bf16 params => bf16 MXU input (halves vreg/VMEM traffic)

    h2 = jnp.dot(w2_ref[...], h1, preferred_element_type=jnp.float32)
    h2 = jnp.maximum(h2 + b2_ref[...].astype(jnp.float32), 0.0)
    h2 = h2.astype(w3_ref.dtype)

    a = jnp.dot(w3_ref[...], h2, preferred_element_type=jnp.float32)
    a = a + b3_ref[...].astype(jnp.float32)
    out_ref[...] = jnp.tanh(a).astype(out_ref.dtype)


def actor_forward(s, params, *, tile_batch=None):
    """Actor MLP forward: s (B, state_dim) -> (B, action_dim)."""
    B, state_dim = s.shape
    mid_dim, state_dim_w = params["w1"].shape
    action_dim = params["w3"].shape[0]
    assert state_dim_w == state_dim

    # ---- adaptive lane-tile selection --------------------------------------
    b_lanes = _round_up(B, LANE)
    if tile_batch is None:
        # * keep each tile <= MAX_DEFAULT_TILE lanes (VMEM-safe on v5e/v6e/v7x)
        # * use >= 2 tiles when there is enough work so the "parallel" grid
        #   axis can feed both v7x TensorCores
        n_tiles = max(1, _cdiv(b_lanes, MAX_DEFAULT_TILE))
        if b_lanes >= 2 * LANE:
            n_tiles = max(n_tiles, 2)
        tile_batch = _round_up(_cdiv(b_lanes, n_tiles), LANE)
    tile_batch = max(LANE, _round_up(tile_batch, LANE))
    tile_batch = min(tile_batch, b_lanes)

    B_pad = _round_up(B, tile_batch)
    grid = (B_pad // tile_batch,)

    # Only the ragged remainder needs padding; there is no transpose of `s`.
    if B_pad != B:
        s = jnp.pad(s, ((0, B_pad - B), (0, 0)))

    out_dtype = s.dtype
    b1 = params["b1"].reshape(mid_dim, 1)
    b2 = params["b2"].reshape(mid_dim, 1)
    b3 = params["b3"].reshape(action_dim, 1)

    # ---- per-step VMEM budget; raise the scoped limit only if needed --------
    act_bytes = jnp.dtype(s.dtype).itemsize
    par_bytes = jnp.dtype(params["w1"].dtype).itemsize
    vmem_needed = (
        2 * tile_batch * state_dim * act_bytes            # s tile, double-buffered
        + 2 * tile_batch * action_dim * act_bytes          # out tile, double-buffered
        + 2 * tile_batch * mid_dim * 4                     # h1/h2 f32 intermediates
        + 2 * (mid_dim * state_dim + mid_dim * mid_dim + action_dim * mid_dim
               + 2 * mid_dim + action_dim) * par_bytes)    # resident weights/biases
    vmem_limit = None
    if vmem_needed > 12 * 1024 * 1024:                     # past v5e's 16 MiB default
        vmem_limit = min(int(vmem_needed * 3 // 2), 48 * 1024 * 1024)  # < v7x 64 MiB physical

    in_specs = [
        pl.BlockSpec((tile_batch, state_dim), lambda i: (i, 0)),   # s (natural layout)
        pl.BlockSpec((mid_dim, state_dim), lambda i: (0, 0)),      # w1 (VMEM-resident)
        pl.BlockSpec((mid_dim, 1), lambda i: (0, 0)),              # b1
        pl.BlockSpec((mid_dim, mid_dim), lambda i: (0, 0)),        # w2
        pl.BlockSpec((mid_dim, 1), lambda i: (0, 0)),              # b2
        pl.BlockSpec((action_dim, mid_dim), lambda i: (0, 0)),     # w3
        pl.BlockSpec((action_dim, 1), lambda i: (0, 0)),           # b3
    ]
    out_spec = pl.BlockSpec((action_dim, tile_batch), lambda i: (0, i))

    out_t = pl.pallas_call(
        actor_kernel,
        out_shape=jax.ShapeDtypeStruct((action_dim, B_pad), out_dtype),
        grid_spec=pl.GridSpec(grid=grid, in_specs=in_specs, out_specs=out_spec),
        compiler_params=pltpu.CompilerParams(
            dimension_semantics=("parallel",),
            vmem_limit_bytes=vmem_limit,
        ),
    )(s, params["w1"], b1, params["w2"], b2, params["w3"], b3)

    # Back to PyTorch layout (B, action_dim); drop batch padding.
    return jnp.transpose(out_t[:, :B])


def init_actor_params(key, state_dim, action_dim, mid_dim, dtype=jnp.float32):
    """PyTorch nn.Linear default init (U[-1/sqrt(fan_in), 1/sqrt(fan_in)]),
    weights stored PyTorch-native as (out_features, in_features)."""
    keys = jax.random.split(key, 6)

    def linear(kw, kb, fan_in, fan_out):
        bound = 1.0 / jnp.sqrt(jnp.float32(fan_in))
        w = jax.random.uniform(kw, (fan_out, fan_in), jnp.float32, -bound, bound)
        b = jax.random.uniform(kb, (fan_out,), jnp.float32, -bound, bound)
        return w.astype(dtype), b.astype(dtype)

    w1, b1 = linear(keys[0], keys[1], state_dim, mid_dim)
    w2, b2 = linear(keys[2], keys[3], mid_dim, mid_dim)
    w3, b3 = linear(keys[4], keys[5], mid_dim, action_dim)
    return {"w1": w1, "b1": b1, "w2": w2, "b2": b2, "w3": w3, "b3": b3}


def actor_ref(s, p):
    """Pure-JAX reference (PyTorch semantics: y = x @ W.T + b)."""
    h1 = jnp.maximum(s @ p["w1"].T + p["b1"], 0.0)
    h2 = jnp.maximum(h1 @ p["w2"].T + p["b2"], 0.0)
    return jnp.tanh(h2 @ p["w3"].T + p["b3"])


if __name__ == "__main__":
    key = jax.random.PRNGKey(0)
    k_params, k_state = jax.random.split(key)

    batch = 8
    state_dim = 16
    action_dim = 8
    mid_dim = 32

    params = init_actor_params(k_params, state_dim, action_dim, mid_dim)
    s = jax.random.normal(k_state, (batch, state_dim), jnp.float32)

    ref = actor_ref(s, params)

    # f32 streaming path (exact PyTorch semantics).
    out = jax.block_until_ready(actor_forward(s, params))
    assert out.shape == (batch, action_dim)
    assert jnp.allclose(out, ref, atol=1e-5, rtol=1e-5)

    # bf16 streaming path (v6e/v7x recommendation): bf16 HBM/VMEM traffic,
    # f32 MXU accumulation and element-wise math -> looser tolerance.
    params_bf16 = jax.tree_util.tree_map(lambda x: x.astype(jnp.bfloat16), params)
    out_bf16 = jax.block_until_ready(
        actor_forward(s.astype(jnp.bfloat16), params_bf16))
    assert out_bf16.shape == (batch, action_dim)
    assert jnp.allclose(out_bf16.astype(jnp.float32), ref, atol=2e-2, rtol=2e-2)

    print("KERNEL_OK")
</pallas_src>

<mosaic_0001>
module attributes {stable_mosaic.version = 11 : i64} {
  func.func @actor_kernel(%arg0: i32, %arg1: memref<128x16xf32, #tpu.memory_space<vmem>>, %arg2: memref<32x16xf32, #tpu.memory_space<vmem>>, %arg3: memref<32x1xf32, #tpu.memory_space<vmem>>, %arg4: memref<32x32xf32, #tpu.memory_space<vmem>>, %arg5: memref<32x1xf32, #tpu.memory_space<vmem>>, %arg6: memref<8x32xf32, #tpu.memory_space<vmem>>, %arg7: memref<8x1xf32, #tpu.memory_space<vmem>>, %arg8: memref<8x128xf32, #tpu.memory_space<vmem>>) attributes {dimension_semantics = [#tpu.dimension_semantics<parallel>], iteration_bounds = array<i64: 1>, scalar_prefetch = 0 : i64, scratch_operands = 0 : i64, tpu.core_type = #tpu.core_type<tc>, window_params = [{transform_indices = @transform_0, window_bounds = array<i64: 128, 16>}, {pipeline_mode = #tpu.pipeline_mode<synchronous>, transform_indices = @transform_1, window_bounds = array<i64: 32, 16>}, {pipeline_mode = #tpu.pipeline_mode<synchronous>, transform_indices = @transform_2, window_bounds = array<i64: 32, 1>}, {pipeline_mode = #tpu.pipeline_mode<synchronous>, transform_indices = @transform_3, window_bounds = array<i64: 32, 32>}, {pipeline_mode = #tpu.pipeline_mode<synchronous>, transform_indices = @transform_4, window_bounds = array<i64: 32, 1>}, {pipeline_mode = #tpu.pipeline_mode<synchronous>, transform_indices = @transform_5, window_bounds = array<i64: 8, 32>}, {pipeline_mode = #tpu.pipeline_mode<synchronous>, transform_indices = @transform_6, window_bounds = array<i64: 8, 1>}, {transform_indices = @transform_7, window_bounds = array<i64: 8, 128>}]} {
    %c0 = arith.constant 0 : index
    %c0_0 = arith.constant 0 : index
    %0 = vector.load %arg1[%c0, %c0_0] : memref<128x16xf32, #tpu.memory_space<vmem>>, vector<128x16xf32>
    %c0_1 = arith.constant 0 : index
    %c0_2 = arith.constant 0 : index
    %1 = vector.load %arg2[%c0_1, %c0_2] : memref<32x16xf32, #tpu.memory_space<vmem>>, vector<32x16xf32>
    %cst = arith.constant dense<0.000000e+00> : vector<32x128xf32>
    %2 = tpu.matmul %1, %0, %cst {dimension_numbers = #tpu.dot_dimension_numbers<[1], [1], [0], [0], [0, 0, 1, 0], [], []>} : vector<32x16xf32>, vector<128x16xf32>, vector<32x128xf32> -> vector<32x128xf32>
    %c0_3 = arith.constant 0 : index
    %c0_4 = arith.constant 0 : index
    %3 = vector.load %arg3[%c0_3, %c0_4] : memref<32x1xf32, #tpu.memory_space<vmem>>, vector<32x1xf32>
    %4 = vector.broadcast %3 : vector<32x1xf32> to vector<32x128xf32>
    %5 = arith.addf %2, %4 : vector<32x128xf32>
    %cst_5 = arith.constant 0.000000e+00 : f32
    %6 = vector.broadcast %cst_5 : f32 to vector<32x128xf32>
    %7 = arith.maximumf %5, %6 : vector<32x128xf32>
    %c0_6 = arith.constant 0 : index
    %c0_7 = arith.constant 0 : index
    %8 = vector.load %arg4[%c0_6, %c0_7] : memref<32x32xf32, #tpu.memory_space<vmem>>, vector<32x32xf32>
    %cst_8 = arith.constant dense<0.000000e+00> : vector<32x128xf32>
    %9 = tpu.matmul %8, %7, %cst_8 {dimension_numbers = #tpu.dot_dimension_numbers<[1], [0], [0], [1], [0, 0, 1, 1], [], []>} : vector<32x32xf32>, vector<32x128xf32>, vector<32x128xf32> -> vector<32x128xf32>
    %c0_9 = arith.constant 0 : index
    %c0_10 = arith.constant 0 : index
    %10 = vector.load %arg5[%c0_9, %c0_10] : memref<32x1xf32, #tpu.memory_space<vmem>>, vector<32x1xf32>
    %11 = vector.broadcast %10 : vector<32x1xf32> to vector<32x128xf32>
    %12 = arith.addf %9, %11 : vector<32x128xf32>
    %cst_11 = arith.constant 0.000000e+00 : f32
    %13 = vector.broadcast %cst_11 : f32 to vector<32x128xf32>
    %14 = arith.maximumf %12, %13 : vector<32x128xf32>
    %c0_12 = arith.constant 0 : index
    %c0_13 = arith.constant 0 : index
    %15 = vector.load %arg6[%c0_12, %c0_13] : memref<8x32xf32, #tpu.memory_space<vmem>>, vector<8x32xf32>
    %cst_14 = arith.constant dense<0.000000e+00> : vector<8x128xf32>
    %16 = tpu.matmul %15, %14, %cst_14 {dimension_numbers = #tpu.dot_dimension_numbers<[1], [0], [0], [1], [0, 0, 1, 1], [], []>} : vector<8x32xf32>, vector<32x128xf32>, vector<8x128xf32> -> vector<8x128xf32>
    %c0_15 = arith.constant 0 : index
    %c0_16 = arith.constant 0 : index
    %17 = vector.load %arg7[%c0_15, %c0_16] : memref<8x1xf32, #tpu.memory_space<vmem>>, vector<8x1xf32>
    %18 = vector.broadcast %17 : vector<8x1xf32> to vector<8x128xf32>
    %19 = arith.addf %16, %18 : vector<8x128xf32>
    %20 = math.tanh %19 : vector<8x128xf32>
    %c0_17 = arith.constant 0 : index
    %c0_18 = arith.constant 0 : index
    %21 = vector.load %arg8[%c0_17, %c0_18] : memref<8x128xf32, #tpu.memory_space<vmem>>, vector<8x128xf32>
    tpu.vector_store %arg8[%c0_17, %c0_18], %20 {strides = array<i32>} : memref<8x128xf32, #tpu.memory_space<vmem>>, vector<8x128xf32>,
    return
  }
  func.func @transform_0(%arg0: i32) -> (i32, i32) {
    %c0_i32 = arith.constant 0 : i32
    %c0_i32_0 = arith.constant 0 : i32
    return %arg0, %c0_i32 : i32, i32
  }
  func.func @transform_1(%arg0: i32) -> (i32, i32) {
    %c0_i32 = arith.constant 0 : i32
    %c0_i32_0 = arith.constant 0 : i32
    %c0_i32_1 = arith.constant 0 : i32
    return %c0_i32, %c0_i32_0 : i32, i32
  }
  func.func @transform_2(%arg0: i32) -> (i32, i32) {
    %c0_i32 = arith.constant 0 : i32
    %c0_i32_0 = arith.constant 0 : i32
    %c0_i32_1 = arith.constant 0 : i32
    return %c0_i32, %c0_i32_0 : i32, i32
  }
  func.func @transform_3(%arg0: i32) -> (i32, i32) {
    %c0_i32 = arith.constant 0 : i32
    %c0_i32_0 = arith.constant 0 : i32
    %c0_i32_1 = arith.constant 0 : i32
    return %c0_i32, %c0_i32_0 : i32, i32
  }
  func.func @transform_4(%arg0: i32) -> (i32, i32) {
    %c0_i32 = arith.constant 0 : i32
    %c0_i32_0 = arith.constant 0 : i32
    %c0_i32_1 = arith.constant 0 : i32
    return %c0_i32, %c0_i32_0 : i32, i32
  }
  func.func @transform_5(%arg0: i32) -> (i32, i32) {
    %c0_i32 = arith.constant 0 : i32
    %c0_i32_0 = arith.constant 0 : i32
    %c0_i32_1 = arith.constant 0 : i32
    return %c0_i32, %c0_i32_0 : i32, i32
  }
  func.func @transform_6(%arg0: i32) -> (i32, i32) {
    %c0_i32 = arith.constant 0 : i32
    %c0_i32_0 = arith.constant 0 : i32
    %c0_i32_1 = arith.constant 0 : i32
    return %c0_i32, %c0_i32_0 : i32, i32
  }
  func.func @transform_7(%arg0: i32) -> (i32, i32) {
    %c0_i32 = arith.constant 0 : i32
    %c0_i32_0 = arith.constant 0 : i32
    return %c0_i32, %arg0 : i32, i32
  }
}

</mosaic_0001>

<bundles_post_ra>
// kernel: tpu_custom_call.1
= control target key start
LH: loop header
LB: loop body
LE: loop exit
PB: predicated region body
PF: predicated region fallthrough
CT: control target
= control target key end

     0   :  { %vm71_vm0 = vcmask 130048   ;;  %s549_s0 = inlined_call_operand.vmem [shape: f32[128,16], index: 0, kind: input, shape index: {}]   ;;  %s550_s1 = inlined_call_operand.vmem [shape: f32[32,16], index: 1, kind: input, shape index: {}]   ;;  %s551_s2 = inlined_call_operand.vmem [shape: f32[32,1], index: 2, kind: input, shape index: {}]   ;;  %s552_s3 = inlined_call_operand.vmem [shape: f32[32,32], index: 3, kind: input, shape index: {}]   ;;  %s553_s4 = inlined_call_operand.vmem [shape: f32[32,1], index: 4, kind: input, shape index: {}]   ;;  %s554_s5 = inlined_call_operand.vmem [shape: f32[8,32], index: 5, kind: input, shape index: {}]   ;;  %s555_s6 = inlined_call_operand.vmem [shape: f32[8,1], index: 6, kind: input, shape index: {}]   ;;  %s556_s7 = inlined_call_operand.hbm [shape: f32[8,128], index: 7, kind: output, shape index: {}]  }
   0x1   :  { %v42_v0 = vld [vmem:[%s549_s0 + $0x78] sm:$0xff]  ;;  %v41_v1 = vld [vmem:[%s549_s0 + $0x70] sm:$0xff] }
   0x2   :  { %312 = vmatpush.xpose.msk.msra.mxu3 %vm71_vm0, %v42_v0  ;;  %287 = vmatpush.xpose.msk.msra.mxu0 %vm71_vm0, %v42_v0 }
   0x3   :  { %12 = vsyncpa [#allocation3], 0  ;;  %v40_v2 = vld [vmem:[%s549_s0 + $0x68] sm:$0xff]  ;;  %v39_v3 = vld [vmem:[%s549_s0 + $0x60] sm:$0xff]  ;;  %v361_v14 = vmov 0   ;;  %vm193_vm1 = vcmask 261120  }
   0x4   :  { %v38_v4 = vld [vmem:[%s549_s0 + $0x58] sm:$0xff]  ;;  %v37_v5 = vld [vmem:[%s549_s0 + $0x50] sm:$0xff]  ;;  %v36_v6 = vld [vmem:[%s549_s0 + $0x48] sm:$0xff]  ;;  %330 = vset.pattern.permute.xlu0 %v361_v14  ;;  %331 = vset.pattern.permute.xlu1 %v361_v14  ;;  %s278_s20 = sshll.u32 %s556_s7, 4  ;;  %s279_s20 = int_to_ptr.hbm [resolvable:$true] %s278_s20 }
   0x5   :  { %v35_v7 = vld [vmem:[%s549_s0 + $0x40] sm:$0xff]  ;;  %v34_v8 = vld [vmem:[%s549_s0 + $0x38] sm:$0xff]  ;;  %v33_v9 = vld [vmem:[%s549_s0 + $0x30] sm:$0xff]  ;;  %332 = vset.pattern.permute.xlu2 %v361_v14 }
   0x6   :  { %313 = vmatpush.xpose.msk.msra.mxu3 %vm71_vm0, %v41_v1  ;;  %288 = vmatpush.xpose.msk.msra.mxu0 %vm71_vm0, %v41_v1  ;;  %v32_v10 = vld [vmem:[%s549_s0 + $0x28] sm:$0xff]  ;;  %v50_v11 = vld [vmem:[%s551_s2 + $0x18] sm:$0xff]  ;;  %v31_v13 = vld [vmem:[%s549_s0 + $0x20] sm:$0xff] }
   0x7   :  { %v48_v12 = vld [vmem:[%s551_s2 + $0x8] sm:$0xff]  ;;  %68 = vperm.xlu0 %330, %v50_v11   ;;  %v30_v15 = vld [vmem:[%s549_s0 + $0x18] sm:$0xff]  ;;  %v49_v16 = vld [vmem:[%s551_s2 + $0x10] sm:$0xff] }
   0x8   :  { %58 = vperm.xlu1 %331, %v48_v12   ;;  %v47_v17 = vld [vmem:[%s551_s2] sm:$0xff]  ;;  %v29_v18 = vld [vmem:[%s549_s0 + $0x10] sm:$0xff]  ;;  %v28_v19 = vld [vmem:[%s549_s0 + $0x8] sm:$0xff]  ;;  %s362_s2 = smov [#allocation2]  }
   0x9   :  { %v170_v20 = vld [vmem:[%s553_s4 + $0x8] sm:$0xff]  ;;  %v169_v21 = vld [vmem:[%s553_s4] sm:$0xff]  ;;  %v45_v25 = vld [vmem:[%s550_s1 + $0x10] sm:$0xff]  ;;  %s276_s17 = sshll.u32 %s362_s2, 4  ;;  %s277_s17 = int_to_ptr.vmem [resolvable:$true] %s276_s17 }
   0xa   :  { %314 = vmatpush.xpose.msk.msra.mxu3 %vm71_vm0, %v40_v2  ;;  %289 = vmatpush.xpose.msk.msra.mxu0 %vm71_vm0, %v40_v2  ;;  %v27_v22 = vld [vmem:[%s549_s0] sm:$0xff]  ;;  %v44_v23 = vld [vmem:[%s550_s1 + $0x8] sm:$0xff]  ;;  %v46_v26 = vld [vmem:[%s550_s1 + $0x18] sm:$0xff] }
   0xb   :  { %v43_v24 = vld [vmem:[%s550_s1] sm:$0xff]  ;;  %v172_v39 = vld [vmem:[%s553_s4 + $0x18] sm:$0xff]  ;;  %v171_v45 = vld [vmem:[%s553_s4 + $0x10] sm:$0xff] }
   0xc   :  { %190 = vperm.xlu2 %332, %v172_v39   ;;  %v165_v44 = vld [vmem:[%s552_s3] sm:$0xff]  ;;  %v166_v46 = vld [vmem:[%s552_s3 + $0x8] sm:$0xff]  ;;  %v167_v48 = vld [vmem:[%s552_s3 + $0x10] sm:$0xff] }
   0xd   :  { %v240_v47 = vld [vmem:[%s555_s6] sm:$0xff]  ;;  %v168_v49 = vld [vmem:[%s552_s3 + $0x18] sm:$0xff] }
   0xe   :  { %315 = vmatpush.xpose.msk.msra.mxu3 %vm71_vm0, %v39_v3  ;;  %290 = vmatpush.xpose.msk.msra.mxu0 %vm71_vm0, %v39_v3  ;;  %v239_v2 = vld [vmem:[%s554_s5] sm:$0xff] }
   0xf   :  { %63 = vperm.xlu0 %330, %v49_v16  }
  0x10   :  { %53 = vperm.xlu1 %331, %v47_v17  }
  0x12   :  { %316 = vmatpush.xpose.msk.msra.mxu3 %vm71_vm0, %v38_v4  ;;  %291 = vmatpush.xpose.msk.msra.mxu0 %vm71_vm0, %v38_v4 }
  0x14   :  { %185 = vperm.xlu2 %332, %v171_v45  }
  0x16   :  { %317 = vmatpush.xpose.msk.msra.mxu3 %vm71_vm0, %v37_v5  ;;  %292 = vmatpush.xpose.msk.msra.mxu0 %vm71_vm0, %v37_v5 }
  0x17   :  { %180 = vperm.xlu0 %330, %v170_v20  }
  0x18   :  { %175 = vperm.xlu1 %331, %v169_v21  }
  0x1a   :  { %318 = vmatpush.xpose.msk.msra.mxu3 %vm71_vm0, %v36_v6  ;;  %293 = vmatpush.xpose.msk.msra.mxu0 %vm71_vm0, %v36_v6 }
  0x1c   :  { %243 = vperm.xlu2 %332, %v240_v47  }
  0x1e   :  { %319 = vmatpush.xpose.msk.msra.mxu3 %vm71_vm0, %v35_v7  ;;  %294 = vmatpush.xpose.msk.msra.mxu0 %vm71_vm0, %v35_v7 }
  0x22   :  { %320 = vmatpush.xpose.msk.msra.mxu3 %vm71_vm0, %v34_v8  ;;  %295 = vmatpush.xpose.msk.msra.mxu0 %vm71_vm0, %v34_v8 }
  0x26   :  { %321 = vmatpush.xpose.msk.msra.mxu3 %vm71_vm0, %v33_v9  ;;  %296 = vmatpush.xpose.msk.msra.mxu0 %vm71_vm0, %v33_v9 }
  0x2a   :  { %322 = vmatpush.xpose.msk.msra.mxu3 %vm71_vm0, %v32_v10  ;;  %297 = vmatpush.xpose.msk.msra.mxu0 %vm71_vm0, %v32_v10 }
  0x2e   :  { %323 = vmatpush.xpose.msk.msra.mxu3 %vm71_vm0, %v31_v13  ;;  %298 = vmatpush.xpose.msk.msra.mxu0 %vm71_vm0, %v31_v13 }
  0x32   :  { %324 = vmatpush.xpose.msk.msra.mxu3 %vm71_vm0, %v30_v15  ;;  %299 = vmatpush.xpose.msk.msra.mxu0 %vm71_vm0, %v30_v15 }
  0x36   :  { %325 = vmatpush.xpose.msk.msra.mxu3 %vm71_vm0, %v29_v18  ;;  %300 = vmatpush.xpose.msk.msra.mxu0 %vm71_vm0, %v29_v18 }
  0x3a   :  { %326 = vmatpush.xpose.msk.msra.mxu3 %vm71_vm0, %v28_v19  ;;  %301 = vmatpush.xpose.msk.msra.mxu0 %vm71_vm0, %v28_v19 }
  0x3e   :  { %327 = vmatpush.xpose.msk.msra.mxu3 %vm71_vm0, %v27_v22  ;;  %302 = vmatpush.xpose.msk.msra.mxu0 %vm71_vm0, %v27_v22 }
  0x41   :  { %304 = vmatmul.msk.f32.vlgmr.msra.gmra.mxu3 %vm71_vm0, %v44_v23  ;;  %303 = vmatmul.msk.f32.vlgmr.msra.gmra.mxu0 %vm71_vm0, %v43_v24 }
  0x49   :  { %305 = vmatmul.msk.f32.gmra.mxu3 %vm71_vm0, %v45_v25 }
  0x51   :  { %306 = vmatmul.msk.f32.gmra.mxu3 %vm71_vm0, %v46_v26 }
  0x66   :  { %v191_v52 = vpop.permute.xlu2 %190 }
  0x6e   :  { %v186_v54 = vpop.permute.xlu2 %185 }
  0x76   :  { %v244_v3 = vpop.permute.xlu2 %243 }
  0x79   :  { %v69_v28 = vpop.permute.xlu0 %68 }
  0x7a   :  { %v59_v30 = vpop.permute.xlu1 %58 }
  0x81   :  { %v64_v31 = vpop.permute.xlu0 %63 }
  0x82   :  { %v54_v38 = vpop.permute.xlu1 %53 }
  0x89   :  { %v181_v58 = vpop.permute.xlu0 %180 }
  0x8a   :  { %v176_v61 = vpop.permute.xlu1 %175 }
  0xbe   :  { %v149_v35 = vpop.f32.mrf.mxu0 }
  0xbf   :  { %v150_v41 = vadd.f32 %v149_v35, %v54_v38 }
  0xc1   :  { %v161_v43 = vmax.f32 %v150_v41, 0.0 }
  0xc4   :  { %v152_v27 = vpop.f32.mrf.mxu3 }
  0xc5   :  { %v153_v36 = vadd.f32 %v152_v27, %v59_v30 }
  0xc7   :  { %v162_v42 = vmax.f32 %v153_v36, 0.0 }
  0xcc   :  { %v155_v29 = vpop.f32.mrf.mxu3 }
  0xcd   :  { %v156_v33 = vadd.f32 %v155_v29, %v64_v31 }
  0xcf   :  { %v163_v40 = vmax.f32 %v156_v33, 0.0 }
  0xd4   :  { %v158_v32 = vpop.f32.mrf.mxu3 }
  0xd5   :  { %v159_v34 = vadd.f32 %v158_v32, %v69_v28 }
  0xd7   :  { %v164_v37 = vmax.f32 %v159_v34, 0.0 }
  0xd9   :  { %218 = vmatpush.msra.mxu1 %v164_v37 }
  0xdb   :  { %219 = vmatpush.msra.mxu1 %v163_v40 }
  0xdd   :  { %220 = vmatpush.msra.mxu1 %v162_v42 }
  0xdf   :  { %221 = vmatpush.msra.mxu1 %v161_v43 }
  0xe0   :  { %307 = vmatmul.msk.f32.vlgmr.msra.gmra.mxu1 %vm193_vm1, %v165_v44 }
  0xe8   :  { %308 = vmatmul.msk.f32.gmra.mxu1 %vm193_vm1, %v166_v46 }
  0xf0   :  { %309 = vmatmul.msk.f32.gmra.mxu1 %vm193_vm1, %v167_v48 }
  0xf8   :  { %310 = vmatmul.msk.f32.gmra.mxu1 %vm193_vm1, %v168_v49 }
 0x15d   :  { %v223_v50 = vpop.f32.mrf.mxu1 }
 0x15e   :  { %v224_v62 = vadd.f32 %v223_v50, %v176_v61 }
 0x160   :  { %v235_v1 = vmax.f32 %v224_v62, 0.0 }
 0x165   :  { %v226_v51 = vpop.f32.mrf.mxu1 }
 0x166   :  { %v227_v59 = vadd.f32 %v226_v51, %v181_v58 }
 0x168   :  { %v236_v0 = vmax.f32 %v227_v59, 0.0 }
 0x16d   :  { %v229_v53 = vpop.f32.mrf.mxu1 }
 0x16e   :  { %v230_v56 = vadd.f32 %v229_v53, %v186_v54 }
 0x170   :  { %v237_v63 = vmax.f32 %v230_v56, 0.0 }
 0x175   :  { %v232_v55 = vpop.f32.mrf.mxu1 }
 0x176   :  { %v233_v57 = vadd.f32 %v232_v55, %v191_v52 }
 0x178   :  { %v238_v60 = vmax.f32 %v233_v57, 0.0 }
 0x17a   :  { %261 = vmatpush.msra.mxu2 %v238_v60 }
 0x17c   :  { %262 = vmatpush.msra.mxu2 %v237_v63 }
 0x17e   :  { %263 = vmatpush.msra.mxu2 %v236_v0 }
 0x180   :  { %264 = vmatpush.msra.mxu2 %v235_v1 }
 0x181   :  { %311 = vmatmul.msk.f32.vlgmr.msra.gmra.mxu2 %vm193_vm1, %v239_v2 }
 0x204   :  { %v266_v4 = vpop.f32.mrf.mxu2 }
 0x205   :  { %v267_v5 = vadd.f32 %v266_v4, %v244_v3 }
 0x207   :  { %333 = vtanh.f32 %v267_v5 }
 0x20d   :  { %v334_v6 = vpop.eup %333 }
 0x20e   :  { %270 = vst [vmem:[#allocation2] sm:$0xff] %v334_v6 }
 0x20f   :  { %281 = dma.vmem_to_hbm [thread:$0]  %s277_s17, 128, %s279_s20, [#allocation3]  }
 0x210   :  { %359 = dma.done.wait [#allocation3], 128  }
 0x211   :  { %360 = vsyncadd [#allocation3], 4294967168 }
 0x212   :  { %286 = vsyncpa [#allocation3], 1 }

</bundles_post_ra>
